<compile_context>
chip_gen: v5e
topology: v5e:2x2
jax: 0.10.0
libtpu: 0.0.40
codegen_flags: <defaults>
</compile_context>

<pallas_src>
import jax
import jax.numpy as jnp
from jax.experimental import pallas as pl
from jax.experimental.pallas import tpu as pltpu


def _round_up(x, m):
    return ((x + m - 1) // m) * m


def _rdrop_kernel(p_ref, q_ref, out_ref):
    p = p_ref[...].astype(jnp.float32)
    q = q_ref[...].astype(jnp.float32)

    # Numerically stable log-softmax; reuse the exps for the softmax itself
    # (halves EUP transcendental work vs. exp(log_softmax)).
    p_max = jnp.max(p, axis=-1, keepdims=True)
    p_sh = p - p_max
    exp_p = jnp.exp(p_sh)
    sum_p = jnp.sum(exp_p, axis=-1, keepdims=True)
    lsm_p = p_sh - jnp.log(sum_p)
    sm_p = exp_p * (1.0 / sum_p)          # exact reciprocal (keeps tight rtol)

    q_max = jnp.max(q, axis=-1, keepdims=True)
    q_sh = q - q_max
    exp_q = jnp.exp(q_sh)
    sum_q = jnp.sum(exp_q, axis=-1, keepdims=True)
    lsm_q = q_sh - jnp.log(sum_q)
    sm_q = exp_q * (1.0 / sum_q)

    # sm_q*(lsm_q - lsm_p) + sm_p*(lsm_p - lsm_q) == (sm_q - sm_p)*(lsm_q - lsm_p)
    tile_sum = jnp.sum((sm_q - sm_p) * (lsm_q - lsm_p))

    # Lane-dense per-tile partial; the wrapper reads lane 0 of each tile.
    out_ref[...] = jnp.broadcast_to(tile_sum, out_ref.shape).astype(jnp.float32)


def rdrop_loss(p, q, pad_mask=None, reduction="none"):
    """Pallas implementation of RDropLoss(reduction).forward(p, q, pad_mask)."""
    if reduction not in ("sum", "mean", "none", "batchmean"):
        raise ValueError(
            "'reduction' in 'RDropLoss' should be 'sum', 'mean' 'batchmean', "
            "or 'none', but received {}.".format(reduction))
    # NOTE: the reference forward() never uses self.reduction (F.kl_div runs
    # with its own default 'mean'); we mirror that and always return the scalar.
    if pad_mask is not None:
        # TODO(synk): pad_mask path (masked_select on the 0-dim kl_div scalar)
        # is degenerate in the reference and is not implemented here.
        raise NotImplementedError("pad_mask is not supported")
    assert p.shape == q.shape

    C = p.shape[-1]
    p2 = p.reshape(-1, C)
    q2 = q.reshape(-1, C)
    R = p2.shape[0]
    N = R * C  # kl_div 'mean' divisor

    itemsize = jnp.dtype(p2.dtype).itemsize
    # sublane packing multiple for the input dtype (f32:8, bf16:16, int8/fp8:32)
    sublane = {4: 8, 2: 16, 1: 32}.get(itemsize, 8)

    # Row tile: ~1 MiB per (tr, C) input buffer. 2 inputs x 2 pipeline buffers
    # plus f32 compute temporaries stay well inside the scoped VMEM limit on
    # every generation (v5e/v6e 128 MiB physical, v7x 64 MiB physical).
    target_tile_bytes = 1 << 20
    tr = max(sublane, target_tile_bytes // max(1, C * itemsize))
    tr = max(sublane, (tr // sublane) * sublane)
    tr = min(tr, _round_up(R, sublane))

    R_pad = _round_up(R, tr)
    if R_pad != R:
        # Zero pad rows: p_row == q_row  =>  sm_p == sm_q exactly  =>  0 term.
        p2 = jnp.pad(p2, ((0, R_pad - R), (0, 0)))
        q2 = jnp.pad(q2, ((0, R_pad - R), (0, 0)))
    num_tiles = R_pad // tr

    # TODO(synk): vocab-scale C (sublane * C * itemsize approaching the VMEM
    # limit) would need a class-dim grid axis with a streaming two-pass LSE.

    cost = pl.CostEstimate(
        flops=14 * R_pad * C,
        transcendentals=2 * R_pad * C,
        bytes_accessed=2 * R_pad * C * itemsize + num_tiles * 128 * 4,
    )

    partials = pl.pallas_call(
        _rdrop_kernel,
        out_shape=jax.ShapeDtypeStruct((num_tiles, 1, 128), jnp.float32),
        grid=(num_tiles,),
        in_specs=[
            pl.BlockSpec((tr, C), lambda i: (i, 0)),
            pl.BlockSpec((tr, C), lambda i: (i, 0)),
        ],
        out_specs=pl.BlockSpec((1, 1, 128), lambda i: (i, 0, 0)),
        compiler_params=pltpu.CompilerParams(
            dimension_semantics=("parallel",),
            vmem_limit_bytes=48 * 1024 * 1024,
        ),
        cost_estimate=cost,
    )(p2, q2)

    # (p_loss + q_loss) / 2 with each loss = kl_div 'mean' = sum / N
    return (jnp.sum(partials[:, 0, 0]) / (2.0 * N)).astype(jnp.float32)


def _rdrop_loss_ref(p, q):
    # pure-JAX reference for a correctness sanity check
    lsm_p = jax.nn.log_softmax(p, axis=-1)
    lsm_q = jax.nn.log_softmax(q, axis=-1)
    sm_p = jnp.exp(lsm_p)
    sm_q = jnp.exp(lsm_q)
    p_loss = jnp.mean(sm_q * (lsm_q - lsm_p))
    q_loss = jnp.mean(sm_p * (lsm_p - lsm_q))
    return (p_loss + q_loss) / 2.0


if __name__ == "__main__":
    key = jax.random.PRNGKey(0)
    k1, k2 = jax.random.split(key)

    # primary shape: batch=2, seq=8, classes=32
    B, S, C = 2, 8, 32
    p = jax.random.normal(k1, (B, S, C), dtype=jnp.float32)
    q = jax.random.normal(k2, (B, S, C), dtype=jnp.float32)
    loss = jax.block_until_ready(rdrop_loss(p, q))
    ref = jax.block_until_ready(_rdrop_loss_ref(p, q))
    assert jnp.allclose(loss, ref, rtol=1e-4, atol=1e-6), (loss, ref)

    # non-multiple-of-8 row count exercises the zero-padding path
    k3, k4 = jax.random.split(k2)
    p_odd = jax.random.normal(k3, (3, 5, 32), dtype=jnp.float32)
    q_odd = jax.random.normal(k4, (3, 5, 32), dtype=jnp.float32)
    loss_odd = jax.block_until_ready(rdrop_loss(p_odd, q_odd))
    ref_odd = jax.block_until_ready(_rdrop_loss_ref(p_odd, q_odd))
    assert jnp.allclose(loss_odd, ref_odd, rtol=1e-4, atol=1e-6), (loss_odd, ref_odd)

    print("KERNEL_OK")
</pallas_src>

<mosaic_0001>
module attributes {stable_mosaic.version = 11 : i64} {
  func.func @_rdrop_kernel(%arg0: i32, %arg1: memref<16x32xf32, #tpu.memory_space<vmem>>, %arg2: memref<16x32xf32, #tpu.memory_space<vmem>>, %arg3: memref<1x1x128xf32, #tpu.memory_space<vmem>>) attributes {dimension_semantics = [#tpu.dimension_semantics<parallel>], iteration_bounds = array<i64: 1>, scalar_prefetch = 0 : i64, scratch_operands = 0 : i64, tpu.core_type = #tpu.core_type<tc>, window_params = [{transform_indices = @transform_0, window_bounds = array<i64: 16, 32>}, {transform_indices = @transform_1, window_bounds = array<i64: 16, 32>}, {transform_indices = @transform_2, window_bounds = array<i64: 1, 1, 128>}]} {
    %c0 = arith.constant 0 : index
    %c0_0 = arith.constant 0 : index
    %0 = vector.load %arg1[%c0, %c0_0] : memref<16x32xf32, #tpu.memory_space<vmem>>, vector<16x32xf32>
    %c0_1 = arith.constant 0 : index
    %c0_2 = arith.constant 0 : index
    %1 = vector.load %arg2[%c0_1, %c0_2] : memref<16x32xf32, #tpu.memory_space<vmem>>, vector<16x32xf32>
    %cst = arith.constant dense<0xFF800000> : vector<16xf32>
    %2 = vector.multi_reduction <maximumf>, %0, %cst [1] : vector<16x32xf32> to vector<16xf32>
    %3 = vector.shape_cast %2 : vector<16xf32> to vector<16x1xf32>
    %4 = vector.broadcast %3 : vector<16x1xf32> to vector<16x32xf32>
    %5 = arith.subf %0, %4 : vector<16x32xf32>
    %6 = math.exp %5 : vector<16x32xf32>
    %cst_3 = arith.constant dense<0.000000e+00> : vector<16xf32>
    %7 = vector.multi_reduction <add>, %6, %cst_3 [1] : vector<16x32xf32> to vector<16xf32>
    %8 = vector.shape_cast %7 : vector<16xf32> to vector<16x1xf32>
    %9 = math.log %8 : vector<16x1xf32>
    %10 = vector.broadcast %9 : vector<16x1xf32> to vector<16x32xf32>
    %11 = arith.subf %5, %10 : vector<16x32xf32>
    %cst_4 = arith.constant 1.000000e+00 : f32
    %12 = vector.broadcast %cst_4 : f32 to vector<16x1xf32>
    %13 = arith.divf %12, %8 : vector<16x1xf32>
    %14 = vector.broadcast %13 : vector<16x1xf32> to vector<16x32xf32>
    %15 = arith.mulf %6, %14 : vector<16x32xf32>
    %cst_5 = arith.constant dense<0xFF800000> : vector<16xf32>
    %16 = vector.multi_reduction <maximumf>, %1, %cst_5 [1] : vector<16x32xf32> to vector<16xf32>
    %17 = vector.shape_cast %16 : vector<16xf32> to vector<16x1xf32>
    %18 = vector.broadcast %17 : vector<16x1xf32> to vector<16x32xf32>
    %19 = arith.subf %1, %18 : vector<16x32xf32>
    %20 = math.exp %19 : vector<16x32xf32>
    %cst_6 = arith.constant dense<0.000000e+00> : vector<16xf32>
    %21 = vector.multi_reduction <add>, %20, %cst_6 [1] : vector<16x32xf32> to vector<16xf32>
    %22 = vector.shape_cast %21 : vector<16xf32> to vector<16x1xf32>
    %23 = math.log %22 : vector<16x1xf32>
    %24 = vector.broadcast %23 : vector<16x1xf32> to vector<16x32xf32>
    %25 = arith.subf %19, %24 : vector<16x32xf32>
    %cst_7 = arith.constant 1.000000e+00 : f32
    %26 = vector.broadcast %cst_7 : f32 to vector<16x1xf32>
    %27 = arith.divf %26, %22 : vector<16x1xf32>
    %28 = vector.broadcast %27 : vector<16x1xf32> to vector<16x32xf32>
    %29 = arith.mulf %20, %28 : vector<16x32xf32>
    %30 = arith.subf %29, %15 : vector<16x32xf32>
    %31 = arith.subf %25, %11 : vector<16x32xf32>
    %32 = arith.mulf %30, %31 : vector<16x32xf32>
    %33 = vector.shape_cast %32 : vector<16x32xf32> to vector<1x16x32xf32>
    %cst_8 = arith.constant dense<0.000000e+00> : vector<1xf32>
    %34 = vector.multi_reduction <add>, %33, %cst_8 [1, 2] : vector<1x16x32xf32> to vector<1xf32>
    %35 = vector.shape_cast %34 : vector<1xf32> to vector<1x1x1xf32>
    %36 = vector.extract %35[0, 0, 0] : f32 from vector<1x1x1xf32>
    %37 = vector.broadcast %36 : f32 to vector<1x1x128xf32>
    %c0_9 = arith.constant 0 : index
    %c0_10 = arith.constant 0 : index
    %c0_11 = arith.constant 0 : index
    %38 = vector.load %arg3[%c0_9, %c0_10, %c0_11] : memref<1x1x128xf32, #tpu.memory_space<vmem>>, vector<1x1x128xf32>
    tpu.vector_store %arg3[%c0_9, %c0_10, %c0_11], %37 {strides = array<i32>} : memref<1x1x128xf32, #tpu.memory_space<vmem>>, vector<1x1x128xf32>,
    return
  }
  func.func @transform_0(%arg0: i32) -> (i32, i32) {
    %c0_i32 = arith.constant 0 : i32
    %c0_i32_0 = arith.constant 0 : i32
    return %arg0, %c0_i32 : i32, i32
  }
  func.func @transform_1(%arg0: i32) -> (i32, i32) {
    %c0_i32 = arith.constant 0 : i32
    %c0_i32_0 = arith.constant 0 : i32
    return %arg0, %c0_i32 : i32, i32
  }
  func.func @transform_2(%arg0: i32) -> (i32, i32, i32) {
    %c0_i32 = arith.constant 0 : i32
    %c0_i32_0 = arith.constant 0 : i32
    %c0_i32_1 = arith.constant 0 : i32
    return %arg0, %c0_i32, %c0_i32_0 : i32, i32, i32
  }
}

</mosaic_0001>

<bundles_post_ra>
// kernel: tpu_custom_call.1
= control target key start
LH: loop header
LB: loop body
LE: loop exit
PB: predicated region body
PF: predicated region fallthrough
CT: control target
= control target key end

     0   :  { %7 = vsyncpa [#allocation3], 0  ;;  %s415_s0 = inlined_call_operand.hbm [shape: f32[16,32], index: 0, kind: input, shape index: {}]   ;;  %s416_s1 = inlined_call_operand.hbm [shape: f32[16,32], index: 1, kind: input, shape index: {}]   ;;  %s417_s2 = inlined_call_operand.hbm [shape: f32[1,1,128], index: 2, kind: output, shape index: {}]  }
   0x1   :  { %8 = vsyncpa [#allocation6], 0 }
   0x2   :  { %9 = vsyncpa [#allocation4], 0  ;;  %s14_s11 = sshll.u32 %s415_s0, 4  ;;  %s308_s12 = smov [#allocation2]   ;;  %s15_s11 = int_to_ptr.hbm [resolvable:$true] %s14_s11 }
   0x3   :  { %s16_s13 = sshll.u32 %s308_s12, 4  ;;  %s27_s16 = sshll.u32 %s416_s1, 4  ;;  %s17_s13 = int_to_ptr.vmem [resolvable:$true] %s16_s13  ;;  %s28_s16 = int_to_ptr.hbm [resolvable:$true] %s27_s16 }
   0x4   :  { %s309_s17 = smov 128   ;;  %s310_s18 = smov 8  }
   0x5   :  { %22 = dma.hbm_to_vmem [thread:$0]  %s15_s11, 256, %s17_s13, [#allocation3], %s309_s17, %s309_s17, %s310_s18  }
   0x6   :  { %s311_s19 = smov [#allocation5]  }
   0x7   :  { %s29_s20 = sshll.u32 %s311_s19, 4  ;;  %s30_s20 = int_to_ptr.vmem [resolvable:$true] %s29_s20 }
   0x8   :  { %35 = dma.hbm_to_vmem [thread:$0]  %s28_s16, 256, %s30_s20, [#allocation6], %s309_s17, %s309_s17, %s310_s18  }
   0x9   :  { %302 = dma.done.wait [#allocation3], 256  }
   0xa   :  { %303 = vsyncadd [#allocation3], 4294967040 }
   0xb   :  { %304 = dma.done.wait [#allocation6], 256  }
   0xc   :  { %305 = vsyncadd [#allocation6], 4294967040  ;;  %vm48_vm0 = vcmask 261120   ;;  %v46_v0 = vld [vmem:[#allocation5] sm:$0xff]  ;;  %v44_v1 = vld [vmem:[#allocation2] sm:$0xff]  ;;  %s312_s0 = smov [#allocation7]  }
   0xd   :  { %v105_v2 = vsel %vm48_vm0, %v46_v0, -inf  ;;  %v49_v3 = vsel %vm48_vm0, %v44_v1, -inf  ;;  %v47_v4 = vld [vmem:[#allocation5 + $0x8] sm:$0xff]  ;;  %v45_v5 = vld [vmem:[#allocation2 + $0x8] sm:$0xff]  ;;  %s186_s1 = sshll.u32 %s312_s0, 4  ;;  %s188_s23 = sshll.u32 %s417_s2, 4  ;;  %s187_s1 = int_to_ptr.vmem [resolvable:$true] %s186_s1  ;;  %s189_s23 = int_to_ptr.hbm [resolvable:$true] %s188_s23 }
   0xe   :  { %106 = vmax.xlane.f32.xlu1 %v105_v2  ;;  %50 = vmax.xlane.f32.xlu0 %v49_v3  ;;  %v108_v6 = vsel %vm48_vm0, %v47_v4, -inf  ;;  %v52_v7 = vsel %vm48_vm0, %v45_v5, -inf }
  0x16   :  { %109 = vmax.xlane.f32.xlu1 %v108_v6  ;;  %53 = vmax.xlane.f32.xlu0 %v52_v7 }
  0x81   :  { %v107_v8 = vpop.xlane.xlu1 %106  ;;  %v51_v9 = vpop.xlane.xlu0 %50 }
  0x82   :  { %v338_v10 = vsub.f32 %v46_v0, %v107_v8  ;;  %v340_v11 = vsub.f32 %v44_v1, %v51_v9 }
  0x84   :  { %v113_v12 = vmul.f32 1.442695, %v338_v10  ;;  %v57_v13 = vmul.f32 1.442695, %v340_v11 }
  0x86   :  { %206 = vpow2.f32 %v113_v12 }
  0x87   :  { %208 = vpow2.f32 %v57_v13 }
  0x89   :  { %v110_v14 = vpop.xlane.xlu1 %109  ;;  %v54_v15 = vpop.xlane.xlu0 %53 }
  0x8a   :  { %v344_v16 = vsub.f32 %v47_v4, %v110_v14  ;;  %v346_v17 = vsub.f32 %v45_v5, %v54_v15 }
  0x8c   :  { %v348_v18 = vpop.eup %206  ;;  %v115_v19 = vmul.f32 1.442695, %v344_v16  ;;  %v59_v20 = vmul.f32 1.442695, %v346_v17 }
  0x8d   :  { %v352_v21 = vpop.eup %208  ;;  %v117_v22 = vsel %vm48_vm0, %v348_v18, 0.0 }
  0x8e   :  { %210 = vpow2.f32 %v115_v19  ;;  %118 = vadd.xlane.f32.xlu0 %v117_v22  ;;  %v61_v23 = vsel %vm48_vm0, %v352_v21, 0.0 }
  0x8f   :  { %212 = vpow2.f32 %v59_v20  ;;  %62 = vadd.xlane.f32.xlu2 %v61_v23 }
  0x94   :  { %v358_v24 = vpop.eup %210 }
  0x95   :  { %v360_v25 = vpop.eup %212  ;;  %v120_v26 = vsel %vm48_vm0, %v358_v24, 0.0 }
  0x96   :  { %121 = vadd.xlane.f32.xlu1 %v120_v26  ;;  %v64_v27 = vsel %vm48_vm0, %v360_v25, 0.0 }
  0x97   :  { %65 = vadd.xlane.f32.xlu2 %v64_v27 }
 0x101   :  { %v119_v29 = vpop.xlane.xlu0 %118 }
 0x102   :  { %v63_v28 = vpop.xlane.xlu2 %62  ;;  %v138_v38 = vand.u32 2147483647, %v119_v29  ;;  %v140_v40 = vand.u32 2147483648, %v119_v29  ;;  %vm134_vm5 = vweird.f32 %v119_v29 }
 0x103   :  { %214 = vrcp.f32 %v63_v28  ;;  %v82_v42 = vand.u32 2147483647, %v63_v28  ;;  %v84_v43 = vand.u32 2147483648, %v63_v28  ;;  %vm78_vm3 = vweird.f32 %v63_v28 }
 0x104   :  { %216 = vrcp.f32 %v119_v29  ;;  %vm383_vm7 = vcmp.eq.f32.partialorder %v138_v38, 8.507059e+37  ;;  %v141_v54 = vor.u32 1.1754944e-38, %v140_v40 }
 0x105   :  { %218 = vlog2.f32 %v119_v29  ;;  %v85_v58 = vor.u32 1.1754944e-38, %v84_v43  ;;  %vm83_vm8 = vcmp.eq.f32.partialorder %v82_v42, 8.507059e+37 }
 0x109   :  { %v366_v30 = vpop.xlane.xlu1 %121  ;;  %v215_v31 = vpop.eup %214 }
 0x10a   :  { %v217_v32 = vpop.eup %216  ;;  %v74_v33 = vmul.f32 %v215_v31, %v63_v28  ;;  %220 = vrcp.f32 %v366_v30  ;;  %v369_v34 = vpop.xlane.xlu2 %65  ;;  %vm79_vm1 = vweird.f32 %v215_v31  ;;  %v155_v55 = vand.u32 2147483648, %v366_v30 }
 0x10b   :  { %222 = vlog2.f32 %v63_v28  ;;  %v130_v35 = vmul.f32 %v217_v32, %v119_v29  ;;  %v219_v41 = vpop.eup %218  ;;  %vm135_vm2 = vweird.f32 %v217_v32  ;;  %vm374_vm4 = vmor %vm78_vm3, %vm79_vm1  ;;  %vm149_vm9 = vweird.f32 %v366_v30 }
 0x10c   :  { %v75_v36 = vsub.f32 1.0, %v74_v33  ;;  %224 = vlog2.f32 %v366_v30  ;;  %vm379_vm6 = vmor %vm134_vm5, %vm135_vm2  ;;  %v124_v62 = vmul.f32 0.6931472, %v219_v41  ;;  %v153_v63 = vand.u32 2147483647, %v366_v30 }
 0x10d   :  { %v131_v37 = vsub.f32 1.0, %v130_v35  ;;  %226 = vrcp.f32 %v369_v34  ;;  %v156_v4 = vor.u32 1.1754944e-38, %v155_v55  ;;  %v97_v6 = vand.u32 2147483647, %v369_v34 }
 0x10e   :  { %v76_v39 = vmul.f32 %v215_v31, %v75_v36  ;;  %228 = vlog2.f32 %v369_v34  ;;  %v99_v12 = vand.u32 2147483648, %v369_v34  ;;  %vm154_vm13 = vcmp.eq.f32.partialorder %v153_v63, 8.507059e+37 }
 0x10f   :  { %v132_v44 = vmul.f32 %v217_v32, %v131_v37  ;;  %vm93_vm14 = vweird.f32 %v369_v34  ;;  %v127_v26 = vsub.f32 %v338_v10, %v124_v62  ;;  %vm98_vm1 = vcmp.eq.f32.partialorder %v97_v6, 8.507059e+37 }
 0x110   :  { %v221_v45 = vpop.eup %220  ;;  %v77_v46 = vadd.f32 %v215_v31, %v76_v39  ;;  %v100_v28 = vor.u32 1.1754944e-38, %v99_v12 }
 0x111   :  { %v223_v47 = vpop.eup %222  ;;  %v133_v49 = vadd.f32 %v217_v32, %v132_v44  ;;  %v145_v50 = vmul.f32 %v221_v45, %v366_v30  ;;  %vm150_vm10 = vweird.f32 %v221_v45 }
 0x112   :  { %v225_v51 = vpop.eup %224  ;;  %v81_v56 = vsel %vm374_vm4, %v215_v31, %v77_v46  ;;  %v68_v7 = vmul.f32 0.6931472, %v223_v47  ;;  %vm151_vm11 = vmor %vm149_vm9, %vm150_vm10 }
 0x113   :  { %v227_v57 = vpop.eup %226  ;;  %v146_v59 = vsub.f32 1.0, %v145_v50  ;;  %v137_v60 = vsel %vm379_vm6, %v217_v32, %v133_v49  ;;  %v86_v2 = vsel %vm83_vm8, %v85_v58, %v81_v56  ;;  %v126_v8 = vmul.f32 0.6931472, %v225_v51 }
 0x114   :  { %v229_v61 = vpop.eup %228  ;;  %v89_v0 = vmul.f32 %v227_v57, %v369_v34  ;;  %v142_v3 = vsel %vm383_vm7, %v141_v54, %v137_v60  ;;  %vm94_vm12 = vweird.f32 %v227_v57  ;;  %v103_v15 = vmul.f32 %v352_v21, %v86_v2 }
 0x115   :  { %v147_v1 = vmul.f32 %v221_v45, %v146_v59  ;;  %v70_v13 = vmul.f32 0.6931472, %v229_v61  ;;  %v159_v19 = vmul.f32 %v348_v18, %v142_v3  ;;  %v71_v22 = vsub.f32 %v340_v11, %v68_v7  ;;  %vm95_vm15 = vmor %vm93_vm14, %vm94_vm12 }
 0x116   :  { %v90_v5 = vsub.f32 1.0, %v89_v0  ;;  %v128_v29 = vsub.f32 %v344_v16, %v126_v8 }
 0x117   :  { %v148_v9 = vadd.f32 %v221_v45, %v147_v1  ;;  %v72_v30 = vsub.f32 %v346_v17, %v70_v13  ;;  %v161_v31 = vsub.f32 %v159_v19, %v103_v15  ;;  %v163_v34 = vsub.f32 %v127_v26, %v71_v22 }
 0x118   :  { %v91_v14 = vmul.f32 %v227_v57, %v90_v5 }
 0x119   :  { %v152_v20 = vsel %vm151_vm11, %v221_v45, %v148_v9  ;;  %v164_v35 = vsub.f32 %v128_v29, %v72_v30  ;;  %v165_v36 = vmul.f32 %v163_v34, %v161_v31 }
 0x11a   :  { %v92_v23 = vadd.f32 %v227_v57, %v91_v14  ;;  %v157_v27 = vsel %vm154_vm13, %v156_v4, %v152_v20 }
 0x11b   :  { %v160_v18 = vmul.f32 %v358_v24, %v157_v27  ;;  %v167_v37 = vsel %vm48_vm0, %v165_v36, 0.0 }
 0x11c   :  { %v96_v21 = vsel %vm95_vm15, %v227_v57, %v92_v23 }
 0x11d   :  { %v101_v32 = vsel %vm98_vm1, %v100_v28, %v96_v21 }
 0x11e   :  { %v104_v33 = vmul.f32 %v360_v25, %v101_v32 }
 0x120   :  { %v162_v11 = vsub.f32 %v160_v18, %v104_v33 }
 0x122   :  { %v166_v10 = vmul.f32 %v164_v35, %v162_v11 }
 0x124   :  { %v168_v38 = vsel %vm48_vm0, %v166_v10, 0.0 }
 0x125   :  { %v169_v39 = vadd.f32 %v168_v38, %v167_v37 }
 0x127   :  { %170 = vadd.xlane.f32.xlu2 %v169_v39 }
 0x19a   :  { %v171_v16 = vpop.xlane.xlu2 %170 }
 0x19b   :  { %v172_v17 = vrot.slane %v171_v16, 4 }
 0x19d   :  { %v173_v40 = vadd.f32 %v172_v17, %v171_v16 }
 0x19f   :  { %v174_v41 = vrot.slane %v173_v40, 2 }
 0x1a1   :  { %v175_v24 = vadd.f32 %v174_v41, %v173_v40 }
 0x1a3   :  { %v176_v42 = vrot.slane %v175_v24, 1 }
 0x1a5   :  { %v177_v43 = vadd.f32 %v176_v42, %v175_v24 }
 0x1a7   :  { %199 = vpush %v177_v43 }
 0x1d8   :  { %s200_s24 = spop %199 }
 0x1d9   :  { %v179_v25 = vstv %s200_s24 }
 0x1da   :  { %180 = vst [vmem:[#allocation7] sm:$0x1] %v179_v25 }
 0x1db   :  { %191 = dma.vmem_to_hbm [thread:$0]  %s187_s1, 16, %s189_s23, [#allocation4]  }
 0x1dc   :  { %306 = dma.done.wait [#allocation4], 16  }
 0x1dd   :  { %307 = vsyncadd [#allocation4], 4294967280 }
 0x1de   :  { %196 = vsyncpa [#allocation3], 1 }
 0x1df   :  { %197 = vsyncpa [#allocation6], 1 }
 0x1e0   :  { %198 = vsyncpa [#allocation4], 1 }

</bundles_post_ra>
